<compile_context>
chip_gen: v5e
topology: v5e:2x2
jax: 0.10.0
libtpu: 0.0.40
codegen_flags: <defaults>
</compile_context>

<pallas_src>
import math

import jax
import jax.numpy as jnp
from jax.experimental import pallas as pl
from jax.experimental.pallas import tpu as pltpu


# Target tile sizes (clamped / adapted to the padded problem dims).
_TM, _TN, _TK = 512, 512, 2048


def _round_up(x, m):
    return (x + m - 1) // m * m


def _choose_tile(dim, target, align):
    """Pad `dim` to `align`, pick a tile <= ~target that divides the padded dim
    without gross over-padding. Returns (padded_dim, tile)."""
    dim = _round_up(max(dim, 1), align)
    steps = max(1, -(-dim // target))
    tile = _round_up(-(-dim // steps), align)
    return tile * steps, tile


def _kn_tiling(in_features, out_features):
    """Padded K/N dims + tiles for the packed [B,2in] @ [2in,2out] matmul."""
    Kp, tk = _choose_tile(2 * in_features, _TK, 128)
    Np, tn = _choose_tile(2 * out_features, _TN, 128)
    return Kp, Np, tk, tn


def _m_tiling(batch):
    return _choose_tile(batch, _TM, 8)


def _split_for_megacore(Mp, tm, Np, tn):
    """Guarantee >= 2 blocks along a 'parallel' axis so both v7x TCs get work."""
    if Mp // tm >= 2 or Np // tn >= 2:
        return tm, tn
    # Prefer splitting N (keeps each core's X stream identical / contiguous).
    if Np >= 256:
        for cand in range(Np // 2 // 128, 0, -1):
            t = cand * 128
            if Np % t == 0:
                return tm, t
    if Mp >= 16:
        for cand in range(Mp // 2 // 8, 0, -1):
            t = cand * 8
            if Mp % t == 0:
                return t, tn
    return tm, tn   # tiny problem: nothing sensible to split


def _packed_matmul_kernel(x_ref, w_ref, b_ref, o_ref):
    """One (tm, tn) output tile; K is the reduction (last grid axis).
    o_ref is k-resident (its block index ignores k), so accumulate in place."""
    k = pl.program_id(2)

    @pl.when(k == 0)
    def _():
        o_ref[...] = jnp.zeros_like(o_ref)

    o_ref[...] += jnp.dot(x_ref[...], w_ref[...],
                          preferred_element_type=jnp.float32)

    @pl.when(k == pl.num_programs(2) - 1)
    def _():
        # Bias added exactly once, on the final K step.
        o_ref[...] += b_ref[...]


def pack_params(real_weight, imag_weight, real_bias, imag_bias,
                compute_dtype=jnp.bfloat16):
    """Pack + pad + cast weights/biases ONCE, outside the per-call hot path.

    real_weight/imag_weight: [out, in]; real_bias/imag_bias: [out].

    Layout (matches the interleaved X packing in complex_linear_pallas):
      row 2k   <- x_real[k] contribution,  row 2k+1 <- x_imag[k]
      col 2j   -> real_out[j],             col 2j+1 -> imag_out[j]
    so that out[:, 2j] = xr @ Wr[j] - xi @ Wi[j] + (br - bi)[j]
           out[:, 2j+1] = xr @ Wi[j] + xi @ Wr[j] + (br + bi)[j]
    exactly reproducing the PyTorch module (bias inside each F.linear).
    """
    out_f, in_f = real_weight.shape
    Kp, Np, _, _ = _kn_tiling(in_f, out_f)

    wr_t = real_weight.T            # [in, out]
    wi_t = imag_weight.T            # [in, out]
    w4 = jnp.stack(
        [jnp.stack([wr_t, wi_t], axis=-1),        # from x_real rows
         jnp.stack([-wi_t, wr_t], axis=-1)],      # from x_imag rows
        axis=1)                                   # [in, 2, out, 2]
    w_packed = w4.reshape(2 * in_f, 2 * out_f).astype(compute_dtype)
    w_packed = jnp.pad(w_packed, ((0, Kp - 2 * in_f), (0, Np - 2 * out_f)))

    b_packed = jnp.stack([real_bias - imag_bias,
                          real_bias + imag_bias], axis=-1).reshape(2 * out_f)
    b_packed = jnp.pad(b_packed.astype(jnp.float32),
                       (0, Np - 2 * out_f)).reshape(1, Np)
    return w_packed, b_packed


def complex_linear_pallas(x, w_packed, b_packed, in_features, out_features,
                          compute_dtype=jnp.bfloat16):
    """x: complex64 [B, in_features]; w_packed/b_packed from pack_params()
    (already cast to compute_dtype / f32 -- no per-call weight cast here)."""
    B = x.shape[0]
    Kp, Np, tk, tn = _kn_tiling(in_features, out_features)
    Mp, tm = _m_tiling(B)
    tm, tn = _split_for_megacore(Mp, tm, Np, tn)

    # One fused pass: interleave (r0, i0, r1, i1, ...) along the lane dim.
    x_packed = jnp.stack([jnp.real(x), jnp.imag(x)], axis=-1)
    x_packed = x_packed.reshape(B, 2 * in_features).astype(compute_dtype)
    x_packed = jnp.pad(x_packed, ((0, Mp - B), (0, Kp - 2 * in_features)))

    grid = (Mp // tm, Np // tn, Kp // tk)

    c_item = jnp.dtype(compute_dtype).itemsize
    vmem_bytes = int(2 * (tm * tk + tk * tn) * c_item      # double-buffered in
                     + 2 * tm * tn * 4                     # output (f32)
                     + 2 * tn * 4)                         # bias
    vmem_limit = min(max(vmem_bytes + (4 << 20), 32 << 20), 48 << 20)

    cost = pl.CostEstimate(
        flops=2 * Mp * Np * Kp,
        transcendentals=0,
        bytes_accessed=int(Mp * Kp * c_item + Kp * Np * c_item
                           + Mp * Np * 4 + Np * 4))

    out_packed = pl.pallas_call(
        _packed_matmul_kernel,
        out_shape=jax.ShapeDtypeStruct((Mp, Np), jnp.float32),
        grid_spec=pltpu.PrefetchScalarGridSpec(
            num_scalar_prefetch=0,
            grid=grid,
            in_specs=[
                pl.BlockSpec((tm, tk), lambda i, j, k: (i, k)),   # X tile
                pl.BlockSpec((tk, tn), lambda i, j, k: (k, j)),   # W tile
                pl.BlockSpec((1, tn), lambda i, j, k: (0, j)),    # bias tile
            ],
            out_specs=pl.BlockSpec((tm, tn), lambda i, j, k: (i, j)),
        ),
        compiler_params=pltpu.CompilerParams(
            dimension_semantics=("parallel", "parallel", "arbitrary"),
            vmem_limit_bytes=vmem_limit),
        cost_estimate=cost,
    )(x_packed, w_packed, b_packed)

    # Columns are interleaved (real_j, imag_j): prefix slice + one fused
    # reassembly pass. (complex64 cannot be produced via bitcast in JAX.)
    pairs = out_packed[:B, :2 * out_features].reshape(B, out_features, 2)
    # TODO(synk): if downstream consumes split real/imag, return
    # (pairs[..., 0], pairs[..., 1]) and skip the complex() pass entirely.
    return jax.lax.complex(pairs[..., 0], pairs[..., 1])


def complex_linear(x, real_weight, imag_weight, real_bias, imag_bias,
                   compute_dtype=jnp.bfloat16):
    """Convenience wrapper matching the PyTorch module signature.
    (Packs the weight per call -- prefer pack_params() once + reuse.)"""
    out_f, in_f = real_weight.shape
    w_packed, b_packed = pack_params(real_weight, imag_weight,
                                     real_bias, imag_bias, compute_dtype)
    return complex_linear_pallas(x, w_packed, b_packed, in_f, out_f,
                                 compute_dtype)


def init_params(key, in_features, out_features):
    """Deterministic init mirroring kaiming_uniform_(a=sqrt(5)) + bias bound."""
    k_wr, k_wi, k_br, k_bi = jax.random.split(key, 4)
    w_bound = 1.0 / math.sqrt(in_features)
    real_weight = jax.random.uniform(k_wr, (out_features, in_features),
                                     jnp.float32, -w_bound, w_bound)
    imag_weight = jax.random.uniform(k_wi, (out_features, in_features),
                                     jnp.float32, -w_bound, w_bound)
    b_bound = 1.0 / math.sqrt(in_features)
    real_bias = jax.random.uniform(k_br, (out_features,), jnp.float32,
                                   -b_bound, b_bound)
    imag_bias = jax.random.uniform(k_bi, (out_features,), jnp.float32,
                                   -b_bound, b_bound)
    return real_weight, imag_weight, real_bias, imag_bias


def reference(x, real_weight, imag_weight, real_bias, imag_bias):
    xr = jnp.real(x)
    xi = jnp.imag(x)
    real_out = (xr @ real_weight.T + real_bias) - (xi @ imag_weight.T + imag_bias)
    imag_out = (xr @ imag_weight.T + imag_bias) + (xi @ real_weight.T + real_bias)
    return jax.lax.complex(real_out, imag_out)


if __name__ == "__main__":
    key = jax.random.PRNGKey(0)
    k_params, k_xr, k_xi = jax.random.split(key, 3)

    batch, in_features, out_features = 8, 32, 32
    real_weight, imag_weight, real_bias, imag_bias = init_params(
        k_params, in_features, out_features)

    xr = jax.random.normal(k_xr, (batch, in_features), jnp.float32)
    xi = jax.random.normal(k_xi, (batch, in_features), jnp.float32)
    x = jax.lax.complex(xr, xi)

    ref = reference(x, real_weight, imag_weight, real_bias, imag_bias)

    # f32 path: bit-accurate vs the reference.
    w_f32, b_f32 = pack_params(real_weight, imag_weight, real_bias, imag_bias,
                               compute_dtype=jnp.float32)
    out_f32 = complex_linear_pallas(x, w_f32, b_f32, in_features, out_features,
                                    compute_dtype=jnp.float32)
    out_f32 = jax.block_until_ready(out_f32)
    assert out_f32.shape == (batch, out_features)
    assert out_f32.dtype == jnp.complex64
    assert jnp.allclose(out_f32, ref, atol=1e-5, rtol=1e-5)

    # bf16 default path: native-MXU, f32 accumulation; looser tolerance.
    w_bf16, b_bf16 = pack_params(real_weight, imag_weight, real_bias, imag_bias)
    out_bf16 = complex_linear_pallas(x, w_bf16, b_bf16,
                                     in_features, out_features)
    out_bf16 = jax.block_until_ready(out_bf16)
    assert out_bf16.shape == (batch, out_features)
    assert out_bf16.dtype == jnp.complex64
    assert jnp.allclose(out_bf16, ref, atol=3e-2, rtol=3e-2)

    # A second small case exercising padding (non-multiple-of-128 dims).
    b2, in2, out2 = 16, 96, 72
    rw2, iw2, rb2, ib2 = init_params(k_params, in2, out2)
    x2 = jax.lax.complex(
        jax.random.normal(k_xr, (b2, in2), jnp.float32),
        jax.random.normal(k_xi, (b2, in2), jnp.float32))
    w2, bb2 = pack_params(rw2, iw2, rb2, ib2, compute_dtype=jnp.float32)
    out2_ = jax.block_until_ready(
        complex_linear_pallas(x2, w2, bb2, in2, out2,
                              compute_dtype=jnp.float32))
    ref2 = reference(x2, rw2, iw2, rb2, ib2)
    assert jnp.allclose(out2_, ref2, atol=1e-5, rtol=1e-5)

    print("KERNEL_OK")
</pallas_src>

<mosaic_0001>
module attributes {stable_mosaic.version = 11 : i64} {
  func.func @_packed_matmul_kernel(%arg0: i32, %arg1: i32, %arg2: i32, %arg3: memref<8x128xf32, #tpu.memory_space<vmem>>, %arg4: memref<128x128xf32, #tpu.memory_space<vmem>>, %arg5: memref<1x128xf32, #tpu.memory_space<vmem>>, %arg6: memref<8x128xf32, #tpu.memory_space<vmem>>) attributes {dimension_semantics = [#tpu.dimension_semantics<parallel>, #tpu.dimension_semantics<parallel>, #tpu.dimension_semantics<arbitrary>], iteration_bounds = array<i64: 1, 1, 1>, scalar_prefetch = 0 : i64, scratch_operands = 0 : i64, tpu.core_type = #tpu.core_type<tc>, window_params = [{transform_indices = @transform_0, window_bounds = array<i64: 8, 128>}, {transform_indices = @transform_1, window_bounds = array<i64: 128, 128>}, {transform_indices = @transform_2, window_bounds = array<i64: 1, 128>}, {transform_indices = @transform_3, window_bounds = array<i64: 8, 128>}]} {
    %c0_i32 = arith.constant 0 : i32
    %0 = arith.cmpi eq, %arg2, %c0_i32 : i32
    %1 = arith.extui %0 : i1 to i32
    %c0_i32_0 = arith.constant 0 : i32
    %2 = arith.cmpi ne, %1, %c0_i32_0 : i32
    scf.if %2 {
      %cst_10 = arith.constant 0.000000e+00 : f32
      %12 = vector.broadcast %cst_10 : f32 to vector<8x128xf32>
      %c0_11 = arith.constant 0 : index
      %c0_12 = arith.constant 0 : index
      %13 = vector.load %arg6[%c0_11, %c0_12] : memref<8x128xf32, #tpu.memory_space<vmem>>, vector<8x128xf32>
      tpu.vector_store %arg6[%c0_11, %c0_12], %12 {strides = array<i32>} : memref<8x128xf32, #tpu.memory_space<vmem>>, vector<8x128xf32>,
    } else {
    }
    %c0 = arith.constant 0 : index
    %c0_1 = arith.constant 0 : index
    %3 = vector.load %arg6[%c0, %c0_1] : memref<8x128xf32, #tpu.memory_space<vmem>>, vector<8x128xf32>
    %c0_2 = arith.constant 0 : index
    %c0_3 = arith.constant 0 : index
    %4 = vector.load %arg3[%c0_2, %c0_3] : memref<8x128xf32, #tpu.memory_space<vmem>>, vector<8x128xf32>
    %c0_4 = arith.constant 0 : index
    %c0_5 = arith.constant 0 : index
    %5 = vector.load %arg4[%c0_4, %c0_5] : memref<128x128xf32, #tpu.memory_space<vmem>>, vector<128x128xf32>
    %cst = arith.constant dense<0.000000e+00> : vector<8x128xf32>
    %6 = tpu.matmul %4, %5, %cst {dimension_numbers = #tpu.dot_dimension_numbers<[1], [0], [0], [1], [0, 0, 1, 1], [], []>} : vector<8x128xf32>, vector<128x128xf32>, vector<8x128xf32> -> vector<8x128xf32>
    %7 = arith.addf %3, %6 : vector<8x128xf32>
    %c0_6 = arith.constant 0 : index
    %c0_7 = arith.constant 0 : index
    %8 = vector.load %arg6[%c0_6, %c0_7] : memref<8x128xf32, #tpu.memory_space<vmem>>, vector<8x128xf32>
    tpu.vector_store %arg6[%c0_6, %c0_7], %7 {strides = array<i32>} : memref<8x128xf32, #tpu.memory_space<vmem>>, vector<8x128xf32>,
    %c0_i32_8 = arith.constant 0 : i32
    %9 = arith.cmpi eq, %arg2, %c0_i32_8 : i32
    %10 = arith.extui %9 : i1 to i32
    %c0_i32_9 = arith.constant 0 : i32
    %11 = arith.cmpi ne, %10, %c0_i32_9 : i32
    scf.if %11 {
      %c0_10 = arith.constant 0 : index
      %c0_11 = arith.constant 0 : index
      %12 = vector.load %arg6[%c0_10, %c0_11] : memref<8x128xf32, #tpu.memory_space<vmem>>, vector<8x128xf32>
      %c0_12 = arith.constant 0 : index
      %c0_13 = arith.constant 0 : index
      %13 = vector.load %arg5[%c0_12, %c0_13] : memref<1x128xf32, #tpu.memory_space<vmem>>, vector<1x128xf32>
      %14 = vector.broadcast %13 : vector<1x128xf32> to vector<8x128xf32>
      %15 = arith.addf %12, %14 : vector<8x128xf32>
      %c0_14 = arith.constant 0 : index
      %c0_15 = arith.constant 0 : index
      %16 = vector.load %arg6[%c0_14, %c0_15] : memref<8x128xf32, #tpu.memory_space<vmem>>, vector<8x128xf32>
      tpu.vector_store %arg6[%c0_14, %c0_15], %15 {strides = array<i32>} : memref<8x128xf32, #tpu.memory_space<vmem>>, vector<8x128xf32>,
    } else {
    }
    return
  }
  func.func @transform_0(%arg0: i32, %arg1: i32, %arg2: i32) -> (i32, i32) {
    %c0_i32 = arith.constant 0 : i32
    return %arg0, %arg2 : i32, i32
  }
  func.func @transform_1(%arg0: i32, %arg1: i32, %arg2: i32) -> (i32, i32) {
    %c0_i32 = arith.constant 0 : i32
    return %arg2, %arg1 : i32, i32
  }
  func.func @transform_2(%arg0: i32, %arg1: i32, %arg2: i32) -> (i32, i32) {
    %c0_i32 = arith.constant 0 : i32
    %c0_i32_0 = arith.constant 0 : i32
    return %c0_i32, %arg1 : i32, i32
  }
  func.func @transform_3(%arg0: i32, %arg1: i32, %arg2: i32) -> (i32, i32) {
    %c0_i32 = arith.constant 0 : i32
    return %arg0, %arg1 : i32, i32
  }
}

</mosaic_0001>

<bundles_post_ra>
// kernel: tpu_custom_call.1
= control target key start
LH: loop header
LB: loop body
LE: loop exit
PB: predicated region body
PF: predicated region fallthrough
CT: control target
= control target key end

     0   :  { %8 = vsyncpa [#allocation3], 0  ;;  %s240_s0 = inlined_call_operand.hbm [shape: f32[8,128], index: 0, kind: input, shape index: {}]   ;;  %s241_s1 = inlined_call_operand.hbm [shape: f32[128,128], index: 1, kind: input, shape index: {}]   ;;  %s242_s2 = inlined_call_operand.vmem [shape: f32[1,128], index: 2, kind: input, shape index: {}]   ;;  %s243_s3 = inlined_call_operand.hbm [shape: f32[8,128], index: 3, kind: output, shape index: {}]  }
   0x1   :  { %9 = vsyncpa [#allocation6], 0 }
   0x2   :  { %10 = vsyncpa [#allocation4], 0  ;;  %s16_s14 = sshll.u32 %s240_s0, 4  ;;  %s203_s15 = smov [#allocation2]   ;;  %s17_s14 = int_to_ptr.hbm [resolvable:$true] %s16_s14 }
   0x3   :  { %s18_s16 = sshll.u32 %s203_s15, 4  ;;  %s26_s19 = sshll.u32 %s241_s1, 4  ;;  %s19_s16 = int_to_ptr.vmem [resolvable:$true] %s18_s16  ;;  %s27_s19 = int_to_ptr.hbm [resolvable:$true] %s26_s19 }
   0x4   :  { %21 = dma.hbm_to_vmem [thread:$0]  %s17_s14, 128, %s19_s16, [#allocation3]  }
   0x5   :  { %s204_s20 = smov [#allocation5]   ;;  %s205_s22 = smov 128  }
   0x6   :  { %s28_s21 = sshll.u32 %s204_s20, 4  ;;  %s206_s23 = smov 8   ;;  %s29_s21 = int_to_ptr.vmem [resolvable:$true] %s28_s21 }
   0x7   :  { %34 = dma.hbm_to_vmem [thread:$0]  %s27_s19, 2048, %s29_s21, [#allocation6], %s205_s22, %s205_s22, %s206_s23  }
   0x8   :  { %197 = dma.done.wait [#allocation3], 128  }
   0x9   :  { %198 = vsyncadd [#allocation3], 4294967168 }
   0xa   :  { %199 = dma.done.wait [#allocation6], 2048  }
   0xb   :  { %200 = vsyncadd [#allocation6], 4294965248  ;;  %v67_v0 = vld [vmem:[#allocation5 + $0x78] sm:$0xff]  ;;  %v66_v1 = vld [vmem:[#allocation5 + $0x70] sm:$0xff]  ;;  %s207_s24 = smov [#allocation7]   ;;  %s107_s28 = sshll.u32 %s243_s3, 4  ;;  %s108_s28 = int_to_ptr.hbm [resolvable:$true] %s107_s28 }
   0xc   :  { %68 = vmatpush.msra.mxu0 %v67_v0  ;;  %v65_v2 = vld [vmem:[#allocation5 + $0x68] sm:$0xff]  ;;  %v64_v3 = vld [vmem:[#allocation5 + $0x60] sm:$0xff]  ;;  %v63_v4 = vld [vmem:[#allocation5 + $0x58] sm:$0xff]  ;;  %s105_s25 = sshll.u32 %s207_s24, 4  ;;  %s106_s25 = int_to_ptr.vmem [resolvable:$true] %s105_s25 }
   0xd   :  { %v62_v5 = vld [vmem:[#allocation5 + $0x50] sm:$0xff]  ;;  %v61_v6 = vld [vmem:[#allocation5 + $0x48] sm:$0xff]  ;;  %v60_v7 = vld [vmem:[#allocation5 + $0x40] sm:$0xff] }
   0xe   :  { %69 = vmatpush.msra.mxu0 %v66_v1  ;;  %v59_v8 = vld [vmem:[#allocation5 + $0x38] sm:$0xff]  ;;  %v58_v9 = vld [vmem:[#allocation5 + $0x30] sm:$0xff]  ;;  %v57_v10 = vld [vmem:[#allocation5 + $0x28] sm:$0xff] }
   0xf   :  { %v56_v11 = vld [vmem:[#allocation5 + $0x20] sm:$0xff]  ;;  %v55_v12 = vld [vmem:[#allocation5 + $0x18] sm:$0xff]  ;;  %v54_v13 = vld [vmem:[#allocation5 + $0x10] sm:$0xff] }
  0x10   :  { %70 = vmatpush.msra.mxu0 %v65_v2  ;;  %v53_v14 = vld [vmem:[#allocation5 + $0x8] sm:$0xff]  ;;  %v52_v15 = vld [vmem:[#allocation5] sm:$0xff]  ;;  %v51_v16 = vld [vmem:[#allocation2] sm:$0xff] }
  0x11   :  { %v124_v17 = vld [vmem:[%s242_s2] ss:$0 sm:$0xff] }
  0x12   :  { %71 = vmatpush.msra.mxu0 %v64_v3 }
  0x14   :  { %72 = vmatpush.msra.mxu0 %v63_v4 }
  0x16   :  { %73 = vmatpush.msra.mxu0 %v62_v5 }
  0x18   :  { %74 = vmatpush.msra.mxu0 %v61_v6 }
  0x1a   :  { %75 = vmatpush.msra.mxu0 %v60_v7 }
  0x1c   :  { %76 = vmatpush.msra.mxu0 %v59_v8 }
  0x1e   :  { %77 = vmatpush.msra.mxu0 %v58_v9 }
  0x20   :  { %78 = vmatpush.msra.mxu0 %v57_v10 }
  0x22   :  { %79 = vmatpush.msra.mxu0 %v56_v11 }
  0x24   :  { %80 = vmatpush.msra.mxu0 %v55_v12 }
  0x26   :  { %81 = vmatpush.msra.mxu0 %v54_v13 }
  0x28   :  { %82 = vmatpush.msra.mxu0 %v53_v14 }
  0x2a   :  { %83 = vmatpush.msra.mxu0 %v52_v15 }
  0x2b   :  { %84 = vmatmul.f32.vlgmr.msra.gmra.mxu0 %v51_v16 }
  0xa8   :  { %v85_v18 = vpop.f32.mrf.mxu0 }
  0xa9   :  { %v98_v19 = vadd.f32 %v124_v17, %v85_v18 }
  0xab   :  { %99 = vst [vmem:[#allocation7] sm:$0xff] %v98_v19 }
  0xac   :  { %110 = dma.vmem_to_hbm [thread:$0]  %s106_s25, 128, %s108_s28, [#allocation4]  }
  0xad   :  { %201 = dma.done.wait [#allocation4], 128  }
  0xae   :  { %202 = vsyncadd [#allocation4], 4294967168 }
  0xaf   :  { %115 = vsyncpa [#allocation3], 1 }
  0xb0   :  { %116 = vsyncpa [#allocation6], 1 }
  0xb1   :  { %117 = vsyncpa [#allocation4], 1 }

</bundles_post_ra>
